<compile_context>
chip_gen: v7x
topology: tpu7x:2x2x1
jax: 0.10.0
libtpu: 0.0.40
codegen_flags: <defaults>
</compile_context>

<pallas_src>
import jax
import jax.numpy as jnp
from jax.experimental import pallas as pl
from jax.experimental.pallas import tpu as pltpu

IN_F = 28 * 28      # 784
H1 = 200
H2 = 200
OUT_F = 10

# MXU / lane-aligned padded sizes.
H1_PAD = 256
H2_PAD = 256
OUT_PAD = 128

NEG_INF = -1e30


def _round_up(n, m):
    return (n + m - 1) // m * m


def _mlp_kernel(x_ref, w1_ref, b1_ref, w2_ref, b2_ref, w3_ref, b3_ref, o_ref):
    # x arrives f32 from HBM; cast to bf16 on the VPU (hides under the MXU).
    x = x_ref[...].astype(jnp.bfloat16)
    # Layer 1: (TB, 784)bf16 @ (784, 256)bf16 -> f32, + bias, relu
    h = jnp.dot(x, w1_ref[...], preferred_element_type=jnp.float32)
    h = jnp.maximum(h + b1_ref[...], 0.0)
    # Layer 2: (TB, 256) @ (256, 256)
    h = jnp.dot(h.astype(jnp.bfloat16), w2_ref[...],
                preferred_element_type=jnp.float32)
    h = jnp.maximum(h + b2_ref[...], 0.0)
    # Layer 3: (TB, 256) @ (256, 128). Padded w3 columns are zero and the padded
    # b3 lanes carry -1e30, so padded logits are already masked for log_softmax.
    logits = jnp.dot(h.astype(jnp.bfloat16), w3_ref[...],
                     preferred_element_type=jnp.float32)
    logits = logits + b3_ref[...]
    # log_softmax along the class dim.
    m = jnp.max(logits, axis=-1, keepdims=True)
    shifted = logits - m
    lse = jnp.log(jnp.sum(jnp.exp(shifted), axis=-1, keepdims=True))
    o_ref[...] = shifted - lse


def net_forward(x, params):
    """x: (B, 784) float32; params: padded bf16 weights / f32 biases from init_params."""
    B = x.shape[0]
    if B <= 256:
        # Small-batch latency path: a single tile (weight-fetch-bound; splitting
        # across cores would just duplicate the weight DMA).
        TB = _round_up(max(B, 1), 16)
    else:
        # Large batch: biggest tile up to 1024 rows that still leaves >= 2 grid
        # steps so the "parallel" axis shards across both v7x TensorCores.
        # VMEM at TB=1024: ~6.3 MiB double-buffered f32 x block + ~1 MiB output
        # + ~1.2 MiB weights -- well inside the default scoped limit.
        TB = min(1024, _round_up(pl.cdiv(B, 2), 256))
    B_pad = _round_up(B, TB)

    # No wrapper-side dtype cast; only pad (zeros) when the batch is ragged.
    if B_pad != B:
        x = jnp.pad(x, ((0, B_pad - B), (0, 0)))

    w1, b1, w2, b2, w3, b3 = (params["w1"], params["b1"], params["w2"],
                              params["b2"], params["w3"], params["b3"])

    n_tiles = B_pad // TB
    tile_spec = lambda shape: pl.BlockSpec(shape, lambda i: (i, 0))   # moves with batch
    pinned = lambda shape: pl.BlockSpec(shape, lambda i: (0, 0))      # VMEM-resident

    flops = 2 * B_pad * (IN_F * H1_PAD + H1_PAD * H2_PAD + H2_PAD * OUT_PAD)
    bytes_accessed = (x.size * 4
                      + (w1.size + w2.size + w3.size) * 2
                      + (b1.size + b2.size + b3.size) * 4
                      + B_pad * OUT_PAD * 4)
    cost = pl.CostEstimate(flops=flops,
                           transcendentals=B_pad * OUT_PAD,
                           bytes_accessed=bytes_accessed)

    out = pl.pallas_call(
        _mlp_kernel,
        out_shape=jax.ShapeDtypeStruct((B_pad, OUT_PAD), jnp.float32),
        grid=(n_tiles,),
        in_specs=[
            tile_spec((TB, IN_F)),
            pinned((IN_F, H1_PAD)),
            pinned((1, H1_PAD)),
            pinned((H1_PAD, H2_PAD)),
            pinned((1, H2_PAD)),
            pinned((H2_PAD, OUT_PAD)),
            pinned((1, OUT_PAD)),
        ],
        out_specs=tile_spec((TB, OUT_PAD)),
        compiler_params=pltpu.CompilerParams(
            dimension_semantics=("parallel",),
        ),
        cost_estimate=cost,
    )(x, w1, b1, w2, b2, w3, b3)

    # Drop padded batch rows and padded class lanes.
    return out[:B, :OUT_F]


def init_params(key):
    """nn.Linear-style uniform(+-1/sqrt(fan_in)) init, zero-padded to aligned shapes.
    Weights stored bf16 (f32 accumulation in-kernel), biases f32. The padded
    class lanes of b3 carry -1e30 so the log_softmax mask is free in-kernel."""
    ks = jax.random.split(key, 6)

    def linear(kw, kb, fan_in, fan_out, fan_in_pad, fan_out_pad, bias_pad_value=0.0):
        bound = 1.0 / jnp.sqrt(float(fan_in))
        w = jax.random.uniform(kw, (fan_in, fan_out), jnp.float32, -bound, bound)
        b = jax.random.uniform(kb, (1, fan_out), jnp.float32, -bound, bound)
        w = jnp.pad(w, ((0, fan_in_pad - fan_in), (0, fan_out_pad - fan_out)))
        b = jnp.pad(b, ((0, 0), (0, fan_out_pad - fan_out)),
                    constant_values=bias_pad_value)
        return w.astype(jnp.bfloat16), b

    w1, b1 = linear(ks[0], ks[1], IN_F, H1, IN_F, H1_PAD)
    w2, b2 = linear(ks[2], ks[3], H1, H2, H1_PAD, H2_PAD)
    w3, b3 = linear(ks[4], ks[5], H2, OUT_F, H2_PAD, OUT_PAD,
                    bias_pad_value=NEG_INF)
    return {"w1": w1, "b1": b1, "w2": w2, "b2": b2, "w3": w3, "b3": b3}


def _reference(x, params):
    """Pure-JAX reference (f32 math on the same padded params) for sanity."""
    w1 = params["w1"].astype(jnp.float32)[:IN_F, :H1]
    w2 = params["w2"].astype(jnp.float32)[:H1, :H2]
    w3 = params["w3"].astype(jnp.float32)[:H2, :OUT_F]
    b1 = params["b1"][:, :H1]
    b2 = params["b2"][:, :H2]
    b3 = params["b3"][:, :OUT_F]
    h = jnp.maximum(x @ w1 + b1, 0.0)
    h = jnp.maximum(h @ w2 + b2, 0.0)
    logits = h @ w3 + b3
    return jax.nn.log_softmax(logits, axis=-1)


if __name__ == "__main__":
    key = jax.random.PRNGKey(0)
    k_x, k_p = jax.random.split(key)
    params = init_params(k_p)

    # Small MNIST-shaped batch, already flattened to (B, 784).
    B = 8
    x = jax.random.normal(k_x, (B, IN_F), dtype=jnp.float32)

    out = jax.block_until_ready(net_forward(x, params))
    assert out.shape == (B, OUT_F)

    # log-softmax rows should exp-sum to ~1
    row_sums = jnp.sum(jnp.exp(out), axis=-1)
    assert bool(jnp.all(jnp.abs(row_sums - 1.0) < 1e-3))

    # Compare against a pure-JAX reference (loose tol: bf16 matmul inputs).
    ref = _reference(x, params)
    assert bool(jnp.max(jnp.abs(out - ref)) < 0.1)

    # Exercise the multi-tile / padded-batch path too (grid >= 2, ragged batch).
    B2 = 300
    x2 = jax.random.normal(jax.random.PRNGKey(1), (B2, IN_F), dtype=jnp.float32)
    out2 = jax.block_until_ready(net_forward(x2, params))
    assert out2.shape == (B2, OUT_F)
    assert bool(jnp.all(jnp.abs(jnp.sum(jnp.exp(out2), axis=-1) - 1.0) < 1e-3))
    ref2 = _reference(x2, params)
    assert bool(jnp.max(jnp.abs(out2 - ref2)) < 0.1)

    print("KERNEL_OK")
</pallas_src>

<mosaic_0001>
module attributes {stable_mosaic.version = 11 : i64} {
  func.func @_mlp_kernel(%arg0: i32, %arg1: memref<16x784xf32, #tpu.memory_space<vmem>>, %arg2: memref<784x256xbf16, #tpu.memory_space<vmem>>, %arg3: memref<1x256xf32, #tpu.memory_space<vmem>>, %arg4: memref<256x256xbf16, #tpu.memory_space<vmem>>, %arg5: memref<1x256xf32, #tpu.memory_space<vmem>>, %arg6: memref<256x128xbf16, #tpu.memory_space<vmem>>, %arg7: memref<1x128xf32, #tpu.memory_space<vmem>>, %arg8: memref<16x128xf32, #tpu.memory_space<vmem>>) attributes {dimension_semantics = [#tpu.dimension_semantics<parallel>], iteration_bounds = array<i64: 1>, scalar_prefetch = 0 : i64, scratch_operands = 0 : i64, tpu.core_type = #tpu.core_type<tc>, window_params = [{transform_indices = @transform_0, window_bounds = array<i64: 16, 784>}, {pipeline_mode = #tpu.pipeline_mode<synchronous>, transform_indices = @transform_1, window_bounds = array<i64: 784, 256>}, {pipeline_mode = #tpu.pipeline_mode<synchronous>, transform_indices = @transform_2, window_bounds = array<i64: 1, 256>}, {pipeline_mode = #tpu.pipeline_mode<synchronous>, transform_indices = @transform_3, window_bounds = array<i64: 256, 256>}, {pipeline_mode = #tpu.pipeline_mode<synchronous>, transform_indices = @transform_4, window_bounds = array<i64: 1, 256>}, {pipeline_mode = #tpu.pipeline_mode<synchronous>, transform_indices = @transform_5, window_bounds = array<i64: 256, 128>}, {pipeline_mode = #tpu.pipeline_mode<synchronous>, transform_indices = @transform_6, window_bounds = array<i64: 1, 128>}, {transform_indices = @transform_7, window_bounds = array<i64: 16, 128>}]} {
    %c0 = arith.constant 0 : index
    %c0_0 = arith.constant 0 : index
    %0 = vector.load %arg1[%c0, %c0_0] : memref<16x784xf32, #tpu.memory_space<vmem>>, vector<16x784xf32>
    %1 = arith.truncf %0 : vector<16x784xf32> to vector<16x784xbf16>
    %c0_1 = arith.constant 0 : index
    %c0_2 = arith.constant 0 : index
    %2 = vector.load %arg2[%c0_1, %c0_2] : memref<784x256xbf16, #tpu.memory_space<vmem>>, vector<784x256xbf16>
    %cst = arith.constant dense<0.000000e+00> : vector<16x256xf32>
    %3 = tpu.matmul %1, %2, %cst {dimension_numbers = #tpu.dot_dimension_numbers<[1], [0], [0], [1], [0, 0, 1, 1], [], []>} : vector<16x784xbf16>, vector<784x256xbf16>, vector<16x256xf32> -> vector<16x256xf32>
    %c0_3 = arith.constant 0 : index
    %c0_4 = arith.constant 0 : index
    %4 = vector.load %arg3[%c0_3, %c0_4] : memref<1x256xf32, #tpu.memory_space<vmem>>, vector<1x256xf32>
    %5 = vector.broadcast %4 : vector<1x256xf32> to vector<16x256xf32>
    %6 = arith.addf %3, %5 : vector<16x256xf32>
    %cst_5 = arith.constant 0.000000e+00 : f32
    %7 = vector.broadcast %cst_5 : f32 to vector<16x256xf32>
    %8 = arith.maximumf %6, %7 : vector<16x256xf32>
    %9 = arith.truncf %8 : vector<16x256xf32> to vector<16x256xbf16>
    %c0_6 = arith.constant 0 : index
    %c0_7 = arith.constant 0 : index
    %10 = vector.load %arg4[%c0_6, %c0_7] : memref<256x256xbf16, #tpu.memory_space<vmem>>, vector<256x256xbf16>
    %cst_8 = arith.constant dense<0.000000e+00> : vector<16x256xf32>
    %11 = tpu.matmul %9, %10, %cst_8 {dimension_numbers = #tpu.dot_dimension_numbers<[1], [0], [0], [1], [0, 0, 1, 1], [], []>} : vector<16x256xbf16>, vector<256x256xbf16>, vector<16x256xf32> -> vector<16x256xf32>
    %c0_9 = arith.constant 0 : index
    %c0_10 = arith.constant 0 : index
    %12 = vector.load %arg5[%c0_9, %c0_10] : memref<1x256xf32, #tpu.memory_space<vmem>>, vector<1x256xf32>
    %13 = vector.broadcast %12 : vector<1x256xf32> to vector<16x256xf32>
    %14 = arith.addf %11, %13 : vector<16x256xf32>
    %cst_11 = arith.constant 0.000000e+00 : f32
    %15 = vector.broadcast %cst_11 : f32 to vector<16x256xf32>
    %16 = arith.maximumf %14, %15 : vector<16x256xf32>
    %17 = arith.truncf %16 : vector<16x256xf32> to vector<16x256xbf16>
    %c0_12 = arith.constant 0 : index
    %c0_13 = arith.constant 0 : index
    %18 = vector.load %arg6[%c0_12, %c0_13] : memref<256x128xbf16, #tpu.memory_space<vmem>>, vector<256x128xbf16>
    %cst_14 = arith.constant dense<0.000000e+00> : vector<16x128xf32>
    %19 = tpu.matmul %17, %18, %cst_14 {dimension_numbers = #tpu.dot_dimension_numbers<[1], [0], [0], [1], [0, 0, 1, 1], [], []>} : vector<16x256xbf16>, vector<256x128xbf16>, vector<16x128xf32> -> vector<16x128xf32>
    %c0_15 = arith.constant 0 : index
    %c0_16 = arith.constant 0 : index
    %20 = vector.load %arg7[%c0_15, %c0_16] : memref<1x128xf32, #tpu.memory_space<vmem>>, vector<1x128xf32>
    %21 = vector.broadcast %20 : vector<1x128xf32> to vector<16x128xf32>
    %22 = arith.addf %19, %21 : vector<16x128xf32>
    %cst_17 = arith.constant dense<0xFF800000> : vector<16xf32>
    %23 = vector.multi_reduction <maximumf>, %22, %cst_17 [1] : vector<16x128xf32> to vector<16xf32>
    %24 = vector.shape_cast %23 : vector<16xf32> to vector<16x1xf32>
    %25 = vector.broadcast %24 : vector<16x1xf32> to vector<16x128xf32>
    %26 = arith.subf %22, %25 : vector<16x128xf32>
    %27 = math.exp %26 : vector<16x128xf32>
    %cst_18 = arith.constant dense<0.000000e+00> : vector<16xf32>
    %28 = vector.multi_reduction <add>, %27, %cst_18 [1] : vector<16x128xf32> to vector<16xf32>
    %29 = vector.shape_cast %28 : vector<16xf32> to vector<16x1xf32>
    %30 = math.log %29 : vector<16x1xf32>
    %31 = vector.broadcast %30 : vector<16x1xf32> to vector<16x128xf32>
    %32 = arith.subf %26, %31 : vector<16x128xf32>
    %c0_19 = arith.constant 0 : index
    %c0_20 = arith.constant 0 : index
    %33 = vector.load %arg8[%c0_19, %c0_20] : memref<16x128xf32, #tpu.memory_space<vmem>>, vector<16x128xf32>
    tpu.vector_store %arg8[%c0_19, %c0_20], %32 {strides = array<i32>} : memref<16x128xf32, #tpu.memory_space<vmem>>, vector<16x128xf32>,
    return
  }
  func.func @transform_0(%arg0: i32) -> (i32, i32) {
    %c0_i32 = arith.constant 0 : i32
    %c0_i32_0 = arith.constant 0 : i32
    return %arg0, %c0_i32 : i32, i32
  }
  func.func @transform_1(%arg0: i32) -> (i32, i32) {
    %c0_i32 = arith.constant 0 : i32
    %c0_i32_0 = arith.constant 0 : i32
    %c0_i32_1 = arith.constant 0 : i32
    return %c0_i32, %c0_i32_0 : i32, i32
  }
  func.func @transform_2(%arg0: i32) -> (i32, i32) {
    %c0_i32 = arith.constant 0 : i32
    %c0_i32_0 = arith.constant 0 : i32
    %c0_i32_1 = arith.constant 0 : i32
    return %c0_i32, %c0_i32_0 : i32, i32
  }
  func.func @transform_3(%arg0: i32) -> (i32, i32) {
    %c0_i32 = arith.constant 0 : i32
    %c0_i32_0 = arith.constant 0 : i32
    %c0_i32_1 = arith.constant 0 : i32
    return %c0_i32, %c0_i32_0 : i32, i32
  }
  func.func @transform_4(%arg0: i32) -> (i32, i32) {
    %c0_i32 = arith.constant 0 : i32
    %c0_i32_0 = arith.constant 0 : i32
    %c0_i32_1 = arith.constant 0 : i32
    return %c0_i32, %c0_i32_0 : i32, i32
  }
  func.func @transform_5(%arg0: i32) -> (i32, i32) {
    %c0_i32 = arith.constant 0 : i32
    %c0_i32_0 = arith.constant 0 : i32
    %c0_i32_1 = arith.constant 0 : i32
    return %c0_i32, %c0_i32_0 : i32, i32
  }
  func.func @transform_6(%arg0: i32) -> (i32, i32) {
    %c0_i32 = arith.constant 0 : i32
    %c0_i32_0 = arith.constant 0 : i32
    %c0_i32_1 = arith.constant 0 : i32
    return %c0_i32, %c0_i32_0 : i32, i32
  }
  func.func @transform_7(%arg0: i32) -> (i32, i32) {
    %c0_i32 = arith.constant 0 : i32
    %c0_i32_0 = arith.constant 0 : i32
    return %arg0, %c0_i32 : i32, i32
  }
}

</mosaic_0001>

<bundles_post_ra>
// kernel: tpu_custom_call.1
= control target key start
LH: loop header
LB: loop body
LE: loop exit
PB: predicated region body
PF: predicated region fallthrough
CT: control target
= control target key end

     0   :  { %12 = vsyncpa [#allocation3], 0  ;;  %s2028_s0 = inlined_call_operand.hbm [shape: f32[16,784], index: 0, kind: input, shape index: {}]   ;;  %s2029_s1 = inlined_call_operand.hbm [shape: bf16[784,256], index: 1, kind: input, shape index: {}]   ;;  %s2030_s2 = inlined_call_operand.vmem [shape: f32[1,256], index: 2, kind: input, shape index: {}]   ;;  %s2031_s3 = inlined_call_operand.hbm [shape: bf16[256,256], index: 3, kind: input, shape index: {}]   ;;  %s2032_s4 = inlined_call_operand.vmem [shape: f32[1,256], index: 4, kind: input, shape index: {}]   ;;  %s2033_s5 = inlined_call_operand.hbm [shape: bf16[256,128], index: 5, kind: input, shape index: {}]   ;;  %s2034_s6 = inlined_call_operand.vmem [shape: f32[1,128], index: 6, kind: input, shape index: {}]   ;;  %s2035_s7 = inlined_call_operand.hbm [shape: f32[16,128], index: 7, kind: output, shape index: {}]  }
   0x1   :  { %13 = vsyncpa [#allocation6], 0 }
   0x2   :  { %14 = vsyncpa [#allocation9], 0 }
   0x3   :  { %15 = vsyncpa [#allocation4], 0  ;;  %s1891_s24 = smov [#allocation5]   ;;  %s1773_s28 = scalar_lea.hbm %s2029_s1, 12544 }
   0x4   :  { %s33_s25 = sshll.u32 %s1891_s24, 4  ;;  %p1774_p0 = scmp.ne.s32.totalorder %s2029_s1, %s1773_s28  ;;  %s34_s25 = int_to_ptr.vmem [resolvable:$true] %s33_s25 }
   0x5   :  { %p1777_p1 = scmp.lt.u32.totalorder %s1773_s28, %s2029_s1 }
   0x7   :  { %p1779_p2 = pnand %p1777_p1, %p1774_p0 }
   0x9   :  { %1782 = shalt.err (!%p1779_p2)
}
   0xa   :  { %s1783_s10 = scalar_lea.vmem %s34_s25, 12544  ;;  %p1788_p4 = scmp.lt.s32.totalorder %s34_s25, %s34_s25 }
   0xb   :  { %p1784_p3 = scmp.ne.s32.totalorder %s34_s25, %s1783_s10  ;;  %p1789_p5 = scmp.lt.s32.totalorder %s1783_s10, %s1783_s10 }
   0xd   :  { %p1790_p6 = por %p1789_p5, %p1788_p4 }
   0xf   :  { %p1791_p7 = pnand %p1790_p6, %p1784_p3 }
  0x11   :  { %1794 = shalt.err (!%p1791_p7)
}
  0x12   :  { %s1892_s11 = smov 128   ;;  %s1893_s12 = smov 8  }
  0x13   :  { %39 = dma.hbm_to_vmem [thread:$0]  %s2029_s1, 12544, %s34_s25, [#allocation6], %s1892_s11, %s1892_s11, %s1893_s12  }
  0x14   :  { %s1894_s15 = smov [#allocation2]   ;;  %s1795_s19 = scalar_lea.hbm %s2028_s0, 1792 }
  0x15   :  { %s21_s16 = sshll.u32 %s1894_s15, 4  ;;  %p1796_p8 = scmp.ne.s32.totalorder %s2028_s0, %s1795_s19  ;;  %s22_s16 = int_to_ptr.vmem [resolvable:$true] %s21_s16 }
  0x16   :  { %p1799_p9 = scmp.lt.u32.totalorder %s1795_s19, %s2028_s0 }
  0x18   :  { %p1801_p10 = pnand %p1799_p9, %p1796_p8 }
  0x1a   :  { %1804 = shalt.err (!%p1801_p10)
}
  0x1b   :  { %s1805_s24 = scalar_lea.vmem %s22_s16, 1792  ;;  %p1810_p12 = scmp.lt.s32.totalorder %s22_s16, %s22_s16 }
  0x1c   :  { %p1806_p11 = scmp.ne.s32.totalorder %s22_s16, %s1805_s24  ;;  %p1811_p13 = scmp.lt.s32.totalorder %s1805_s24, %s1805_s24 }
  0x1e   :  { %p1812_p0 = por %p1811_p13, %p1810_p12 }
  0x20   :  { %p1813_p1 = pnand %p1812_p0, %p1806_p11 }
  0x22   :  { %1816 = shalt.err (!%p1813_p1)
}
  0x23   :  { %s1895_s1 = smov 896   ;;  %s1896_s25 = smov 56  }
  0x24   :  { %27 = dma.hbm_to_vmem [thread:$0]  %s2028_s0, 1792, %s22_s16, [#allocation3], %s1895_s1, %s1895_s1, %s1896_s25  }
  0x25   :  { %s1897_s28 = smov [#allocation7]   ;;  %s1898_s30 = smov [#allocation8]  }
  0x26   :  { %s47_s29 = sshll.u32 %s1897_s28, 4  ;;  %s61_s8 = sshll.u32 %s1898_s30, 4  ;;  %s48_s29 = int_to_ptr.vmem [resolvable:$true] %s47_s29  ;;  %s1970_s8 = int_to_ptr.vmem [resolvable:$true] %s61_s8 }
  0x27   :  { %s1817_s13 = scalar_lea.hbm %s2031_s3, 4096 }
  0x28   :  { %p1818_p2 = scmp.ne.s32.totalorder %s2031_s3, %s1817_s13  ;;  %p1821_p3 = scmp.lt.u32.totalorder %s1817_s13, %s2031_s3 }
  0x2a   :  { %p1823_p4 = pnand %p1821_p3, %p1818_p2 }
  0x2c   :  { %1826 = shalt.err (!%p1823_p4)
}
  0x2d   :  { %s1827_s0 = scalar_lea.vmem %s48_s29, 4096  ;;  %p1832_p6 = scmp.lt.s32.totalorder %s48_s29, %s48_s29 }
  0x2e   :  { %p1828_p5 = scmp.ne.s32.totalorder %s48_s29, %s1827_s0  ;;  %p1833_p7 = scmp.lt.s32.totalorder %s1827_s0, %s1827_s0 }
  0x30   :  { %p1834_p8 = por %p1833_p7, %p1832_p6 }
  0x32   :  { %p1835_p9 = pnand %p1834_p8, %p1828_p5 }
  0x34   :  { %1838 = shalt.err (!%p1835_p9)
}
  0x35   :  { %53 = dma.hbm_to_vmem [thread:$0]  %s2031_s3, 4096, %s48_s29, [#allocation6], %s1892_s11, %s1892_s11, %s1893_s12  }
  0x36   :  { %s1839_s22 = scalar_lea.hbm %s2033_s5, 2048 }
  0x37   :  { %p1840_p10 = scmp.ne.s32.totalorder %s2033_s5, %s1839_s22  ;;  %p1843_p11 = scmp.lt.u32.totalorder %s1839_s22, %s2033_s5 }
  0x39   :  { %p1845_p12 = pnand %p1843_p11, %p1840_p10 }
  0x3b   :  { %1848 = shalt.err (!%p1845_p12)
}
  0x3c   :  { %s1849_s26 = scalar_lea.vmem %s1970_s8, 2048  ;;  %p1854_p0 = scmp.lt.s32.totalorder %s1970_s8, %s1970_s8 }
  0x3d   :  { %p1850_p13 = scmp.ne.s32.totalorder %s1970_s8, %s1849_s26  ;;  %p1855_p1 = scmp.lt.s32.totalorder %s1849_s26, %s1849_s26 }
  0x3f   :  { %p1856_p2 = por %p1855_p1, %p1854_p0 }
  0x41   :  { %p1857_p3 = pnand %p1856_p2, %p1850_p13 }
  0x43   :  { %1860 = shalt.err (!%p1857_p3)
}
  0x44   :  { %s1899_s3 = smov 64   ;;  %s1900_s27 = smov 4  }
  0x45   :  { %67 = dma.hbm_to_vmem [thread:$0]  %s2033_s5, 2048, %s1970_s8, [#allocation9], %s1899_s3, %s1899_s3, %s1900_s27  }
  0x46   :  { %1883 = dma.done.wait [#allocation3], 1792  }
  0x47   :  { %1884 = vsyncadd [#allocation3], 4294965504 }
  0x48   :  { %1885 = dma.done.wait [#allocation6], 16640  }
  0x49   :  { %1886 = vsyncadd [#allocation6], 4294950656 }
  0x4a   :  { %1887 = dma.done.wait [#allocation9], 2048  }
  0x4b   :  { %1888 = vsyncadd [#allocation9], 4294965248  ;;  %v1554_v0 = vld [vmem:[#allocation5 + $0x104] ss:$8 sps:$4 sm:$0xff]   ;;  %v1556_v1 = vld [vmem:[#allocation5 + $0x100] ss:$8 sps:$4 sm:$0xff]  }
  0x4c   :  { %751 = vmatprep.subr.bf16.mxu0 %v1554_v0  ;;  %v1557_v2 = vld [vmem:[#allocation5 + $0x114] ss:$8 sps:$4 sm:$0xff]   ;;  %v1559_v3 = vld [vmem:[#allocation5 + $0x110] ss:$8 sps:$4 sm:$0xff]   ;;  %v1560_v4 = vld [vmem:[#allocation5 + $0x124] ss:$8 sps:$4 sm:$0xff]  }
  0x4d   :  { %752 = vmatpush1.bf16.msra.mxu0 %v1556_v1  ;;  %v1562_v5 = vld [vmem:[#allocation5 + $0x120] ss:$8 sps:$4 sm:$0xff]   ;;  %v1563_v6 = vld [vmem:[#allocation5 + $0x134] ss:$8 sps:$4 sm:$0xff]   ;;  %v1565_v7 = vld [vmem:[#allocation5 + $0x130] ss:$8 sps:$4 sm:$0xff]  }
  0x4e   :  { %753 = vmatprep.subr.bf16.mxu0 %v1557_v2  ;;  %v1566_v8 = vld [vmem:[#allocation5 + $0x144] ss:$8 sps:$4 sm:$0xff]   ;;  %v1568_v9 = vld [vmem:[#allocation5 + $0x140] ss:$8 sps:$4 sm:$0xff]   ;;  %v1569_v10 = vld [vmem:[#allocation5 + $0x154] ss:$8 sps:$4 sm:$0xff]  }
  0x4f   :  { %v1571_v11 = vld [vmem:[#allocation5 + $0x150] ss:$8 sps:$4 sm:$0xff]   ;;  %v1572_v12 = vld [vmem:[#allocation5 + $0x164] ss:$8 sps:$4 sm:$0xff]   ;;  %v1574_v16 = vld [vmem:[#allocation5 + $0x160] ss:$8 sps:$4 sm:$0xff]  }
  0x50   :  { %v86_v13 = vld [vmem:[#allocation2 + $0x18] sm:$0xff]  ;;  %v93_v14 = vld [vmem:[#allocation2 + $0x50] sm:$0xff]  ;;  %v1575_v17 = vld [vmem:[#allocation5 + $0x174] ss:$8 sps:$4 sm:$0xff]   ;;  %vm704_vm0 = vcmask 130048  }
  0x51   :  { %754 = vmatpush1.bf16.msra.mxu0 %v1559_v3  ;;  %v100_v15 = vpack.c.bf16 %v93_v14, %v86_v13  ;;  %v1608_v18 = vld [vmem:[#allocation5 + $0x4] ss:$8 sps:$4 sm:$0xff]   ;;  %v1577_v19 = vld [vmem:[#allocation5 + $0x170] ss:$8 sps:$4 sm:$0xff]   ;;  %v1613_v21 = vld [vmem:[#allocation5] ss:$8 sps:$4 sm:$0xff]  }
  0x52   :  { %755 = vmatprep.subr.bf16.mxu0 %v1560_v4  ;;  %v1578_v20 = vld [vmem:[#allocation5 + $0x184] ss:$8 sps:$4 sm:$0xff]   ;;  %708 = vmatprep.subr.bf16.mxu1 %v1608_v18  ;;  %v1614_v22 = vld [vmem:[#allocation5 + $0x14] ss:$8 sps:$4 sm:$0xff]   ;;  %v1580_v23 = vld [vmem:[#allocation5 + $0x180] ss:$8 sps:$4 sm:$0xff]  }
  0x53   :  { %783 = vmatprep.mubr.bf16.mxu0 %v100_v15  ;;  %709 = vmatpush1.bf16.msra.mxu1 %v1613_v21  ;;  %v1619_v24 = vld [vmem:[#allocation5 + $0x10] ss:$8 sps:$4 sm:$0xff]   ;;  %v1620_v25 = vld [vmem:[#allocation5 + $0x24] ss:$8 sps:$4 sm:$0xff]   ;;  %v1581_v26 = vld [vmem:[#allocation5 + $0x194] ss:$8 sps:$4 sm:$0xff]  }
  0x54   :  { %710 = vmatprep.subr.bf16.mxu1 %v1614_v22  ;;  %v1625_v27 = vld [vmem:[#allocation5 + $0x20] ss:$8 sps:$4 sm:$0xff]   ;;  %v1626_v28 = vld [vmem:[#allocation5 + $0x34] ss:$8 sps:$4 sm:$0xff]   ;;  %v1583_v29 = vld [vmem:[#allocation5 + $0x190] ss:$8 sps:$4 sm:$0xff]  }
  0x55   :  { %756 = vmatpush1.bf16.msra.mxu0 %v1562_v5  ;;  %v1584_v30 = vld [vmem:[#allocation5 + $0x1a4] ss:$8 sps:$4 sm:$0xff]   ;;  %v1631_v31 = vld [vmem:[#allocation5 + $0x30] ss:$8 sps:$4 sm:$0xff]   ;;  %v1586_v33 = vld [vmem:[#allocation5 + $0x1a0] ss:$8 sps:$4 sm:$0xff]  }
  0x56   :  { %757 = vmatprep.subr.bf16.mxu0 %v1563_v6  ;;  %v1632_v32 = vld [vmem:[#allocation5 + $0x44] ss:$8 sps:$4 sm:$0xff]   ;;  %v1587_v34 = vld [vmem:[#allocation5 + $0x1b4] ss:$8 sps:$4 sm:$0xff]   ;;  %v1637_v35 = vld [vmem:[#allocation5 + $0x40] ss:$8 sps:$4 sm:$0xff]  }
  0x57   :  { %711 = vmatpush1.bf16.msra.mxu1 %v1619_v24  ;;  %v1638_v36 = vld [vmem:[#allocation5 + $0x54] ss:$8 sps:$4 sm:$0xff]   ;;  %v1589_v37 = vld [vmem:[#allocation5 + $0x1b0] ss:$8 sps:$4 sm:$0xff]   ;;  %v1590_v38 = vld [vmem:[#allocation5 + $0x1c4] ss:$8 sps:$4 sm:$0xff]  }
  0x58   :  { %712 = vmatprep.subr.bf16.mxu1 %v1620_v25  ;;  %v1643_v39 = vld [vmem:[#allocation5 + $0x50] ss:$8 sps:$4 sm:$0xff]   ;;  %v1644_v40 = vld [vmem:[#allocation5 + $0x64] ss:$8 sps:$4 sm:$0xff]   ;;  %v1592_v41 = vld [vmem:[#allocation5 + $0x1c0] ss:$8 sps:$4 sm:$0xff]  }
  0x59   :  { %758 = vmatpush1.bf16.msra.mxu0 %v1565_v7  ;;  %v1593_v42 = vld [vmem:[#allocation5 + $0x1d4] ss:$8 sps:$4 sm:$0xff]   ;;  %v1649_v43 = vld [vmem:[#allocation5 + $0x60] ss:$8 sps:$4 sm:$0xff]   ;;  %v1595_v45 = vld [vmem:[#allocation5 + $0x1d0] ss:$8 sps:$4 sm:$0xff]  }
  0x5a   :  { %759 = vmatprep.subr.bf16.mxu0 %v1566_v8  ;;  %v1650_v44 = vld [vmem:[#allocation5 + $0x74] ss:$8 sps:$4 sm:$0xff]   ;;  %v1596_v46 = vld [vmem:[#allocation5 + $0x1e4] ss:$8 sps:$4 sm:$0xff]   ;;  %v1655_v47 = vld [vmem:[#allocation5 + $0x70] ss:$8 sps:$4 sm:$0xff]  }
  0x5b   :  { %713 = vmatpush1.bf16.msra.mxu1 %v1625_v27  ;;  %v1656_v48 = vld [vmem:[#allocation5 + $0x84] ss:$8 sps:$4 sm:$0xff]   ;;  %v1598_v49 = vld [vmem:[#allocation5 + $0x1e0] ss:$8 sps:$4 sm:$0xff]   ;;  %v1599_v50 = vld [vmem:[#allocation5 + $0x1f4] ss:$8 sps:$4 sm:$0xff]  }
  0x5c   :  { %714 = vmatprep.subr.bf16.mxu1 %v1626_v28  ;;  %v1661_v51 = vld [vmem:[#allocation5 + $0x80] ss:$8 sps:$4 sm:$0xff]   ;;  %v1662_v52 = vld [vmem:[#allocation5 + $0x94] ss:$8 sps:$4 sm:$0xff]   ;;  %v1601_v53 = vld [vmem:[#allocation5 + $0x1f0] ss:$8 sps:$4 sm:$0xff]  }
  0x5d   :  { %760 = vmatpush1.bf16.msra.mxu0 %v1568_v9  ;;  %v85_v54 = vld [vmem:[#allocation2 + $0x10] sm:$0xff]  ;;  %v92_v55 = vld [vmem:[#allocation2 + $0x48] sm:$0xff]  ;;  %v95_v62 = vld [vmem:[#allocation2 + $0x60] sm:$0xff] }
  0x5e   :  { %761 = vmatprep.subr.bf16.mxu0 %v1569_v10  ;;  %v1604_v56 = vld [vmem:[#allocation5 + $0x204] ss:$8 sps:$4 sm:$0xff]   ;;  %v1667_v57 = vld [vmem:[#allocation5 + $0x90] ss:$8 sps:$4 sm:$0xff]   ;;  %v1602_v58 = vld [vmem:[#allocation5 + $0x200] ss:$8 sps:$4 sm:$0xff]   ;;  %v99_v59 = vpack.c.bf16 %v92_v55, %v85_v54 }
  0x5f   :  { %715 = vmatpush1.bf16.msra.mxu1 %v1631_v31  ;;  %v1668_v60 = vld [vmem:[#allocation5 + $0xa4] ss:$8 sps:$4 sm:$0xff]   ;;  %v88_v61 = vld [vmem:[#allocation2 + $0x28] sm:$0xff]  ;;  %v1673_v1 = vld [vmem:[#allocation5 + $0xa0] ss:$8 sps:$4 sm:$0xff]  }
  0x60   :  { %716 = vmatprep.subr.bf16.mxu1 %v1632_v32  ;;  %v1607_v63 = vld [vmem:[#allocation5 + $0x214] ss:$8 sps:$4 sm:$0xff]   ;;  %v102_v0 = vpack.c.bf16 %v95_v62, %v88_v61  ;;  %v1605_v3 = vld [vmem:[#allocation5 + $0x210] ss:$8 sps:$4 sm:$0xff]   ;;  %v1612_v4 = vld [vmem:[#allocation5 + $0x224] ss:$8 sps:$4 sm:$0xff]  }
  0x61   :  { %762 = vmatpush1.bf16.msra.mxu0 %v1571_v11  ;;  %v1674_v2 = vld [vmem:[#allocation5 + $0xb4] ss:$8 sps:$4 sm:$0xff]   ;;  %v1679_v7 = vld [vmem:[#allocation5 + $0xb0] ss:$8 sps:$4 sm:$0xff]   ;;  %v1680_v9 = vld [vmem:[#allocation5 + $0xc4] ss:$8 sps:$4 sm:$0xff]  }
  0x62   :  { %763 = vmatprep.subr.bf16.mxu0 %v1572_v12  ;;  %v84_v5 = vld [vmem:[#allocation2 + $0x8] sm:$0xff]  ;;  %v91_v6 = vld [vmem:[#allocation2 + $0x40] sm:$0xff]  ;;  %v1610_v10 = vld [vmem:[#allocation5 + $0x220] ss:$8 sps:$4 sm:$0xff]  }
  0x63   :  { %717 = vmatpush1.bf16.msra.mxu1 %v1637_v35  ;;  %v98_v8 = vpack.c.bf16 %v91_v6, %v84_v5  ;;  %v1618_v11 = vld [vmem:[#allocation5 + $0x234] ss:$8 sps:$4 sm:$0xff]   ;;  %v1685_v12 = vld [vmem:[#allocation5 + $0xc0] ss:$8 sps:$4 sm:$0xff]   ;;  %v1616_v14 = vld [vmem:[#allocation5 + $0x230] ss:$8 sps:$4 sm:$0xff]  }
  0x64   :  { %718 = vmatprep.subr.bf16.mxu1 %v1638_v36  ;;  %v1686_v13 = vld [vmem:[#allocation5 + $0xd4] ss:$8 sps:$4 sm:$0xff]   ;;  %v1624_v15 = vld [vmem:[#allocation5 + $0x244] ss:$8 sps:$4 sm:$0xff]   ;;  %v1622_v18 = vld [vmem:[#allocation5 + $0x240] ss:$8 sps:$4 sm:$0xff]  }
  0x65   :  { %764 = vmatpush1.bf16.msra.mxu0 %v1574_v16  ;;  %740 = vmatprep.mubr.bf16.mxu1 %v98_v8  ;;  %v1691_v16 = vld [vmem:[#allocation5 + $0xd0] ss:$8 sps:$4 sm:$0xff]   ;;  %v1698_v21 = vld [vmem:[#allocation5 + $0xf4] ss:$8 sps:$4 sm:$0xff]   ;;  %v1634_v25 = vld [vmem:[#allocation5 + $0x260] ss:$8 sps:$4 sm:$0xff]  }
  0x66   :  { %765 = vmatprep.subr.bf16.mxu0 %v1575_v17  ;;  %v1692_v17 = vld [vmem:[#allocation5 + $0xe4] ss:$8 sps:$4 sm:$0xff]   ;;  %v1628_v22 = vld [vmem:[#allocation5 + $0x250] ss:$8 sps:$4 sm:$0xff]   ;;  %v1703_v28 = vld [vmem:[#allocation7 + $0x4] ss:$8 sps:$4 sm:$0xff]  }
  0x67   :  { %719 = vmatpush1.bf16.msra.mxu1 %v1643_v39  ;;  %v1700_v24 = vld [vmem:[#allocation5 + $0xf0] ss:$8 sps:$4 sm:$0xff]   ;;  %v90_v27 = vld [vmem:[#allocation2 + $0x38] sm:$0xff]  ;;  %v1709_v36 = vld [vmem:[#allocation7 + $0x24] ss:$8 sps:$4 sm:$0xff]  }
  0x68   :  { %720 = vmatprep.subr.bf16.mxu1 %v1644_v40  ;;  %v1706_v32 = vld [vmem:[#allocation7 + $0x14] ss:$8 sps:$4 sm:$0xff]   ;;  %v1704_v35 = vld [vmem:[#allocation7 + $0x10] ss:$8 sps:$4 sm:$0xff]   ;;  %v1707_v39 = vld [vmem:[#allocation7 + $0x20] ss:$8 sps:$4 sm:$0xff]  }
  0x69   :  { %766 = vmatpush1.bf16.msra.mxu0 %v1577_v19  ;;  %v1630_v19 = vld [vmem:[#allocation5 + $0x254] ss:$8 sps:$4 sm:$0xff]   ;;  %v1712_v40 = vld [vmem:[#allocation7 + $0x34] ss:$8 sps:$4 sm:$0xff]   ;;  %v1719_v55 = vld [vmem:[#allocation7 + $0x60] ss:$8 sps:$4 sm:$0xff]  }
  0x6a   :  { %767 = vmatprep.subr.bf16.mxu0 %v1578_v20  ;;  %v1697_v20 = vld [vmem:[#allocation5 + $0xe0] ss:$8 sps:$4 sm:$0xff]   ;;  %v1678_v54 = vld [vmem:[#allocation5 + $0x2d4] ss:$8 sps:$4 sm:$0xff]  }
  0x6b   :  { %721 = vmatpush1.bf16.msra.mxu1 %v1649_v43  ;;  %v1710_v43 = vld [vmem:[#allocation7 + $0x30] ss:$8 sps:$4 sm:$0xff]   ;;  %v1690_v62 = vld [vmem:[#allocation5 + $0x2f4] ss:$8 sps:$4 sm:$0xff]  }
  0x6c   :  { %722 = vmatprep.subr.bf16.mxu1 %v1650_v44  ;;  %v1715_v44 = vld [vmem:[#allocation7 + $0x44] ss:$8 sps:$4 sm:$0xff]   ;;  %v1682_v61 = vld [vmem:[#allocation5 + $0x2e0] ss:$8 sps:$4 sm:$0xff]  }
  0x6d   :  { %768 = vmatpush1.bf16.msra.mxu0 %v1580_v23  ;;  %v1636_v23 = vld [vmem:[#allocation5 + $0x264] ss:$8 sps:$4 sm:$0xff]   ;;  %v1728_v5 = vld [vmem:[#allocation7 + $0x90] ss:$8 sps:$4 sm:$0xff]  }
  0x6e   :  { %769 = vmatprep.subr.bf16.mxu0 %v1581_v26  ;;  %v83_v26 = vld [vmem:[#allocation2] sm:$0xff]  ;;  %v1694_v8 = vld [vmem:[#allocation5 + $0x300] ss:$8 sps:$4 sm:$0xff]  }
  0x6f   :  { %723 = vmatpush1.bf16.msra.mxu1 %v1655_v47  ;;  %v97_v31 = vpack.c.bf16 %v90_v27, %v83_v26  ;;  %v1713_v47 = vld [vmem:[#allocation7 + $0x40] ss:$8 sps:$4 sm:$0xff]  }
  0x70   :  { %724 = vmatprep.subr.bf16.mxu1 %v1656_v48  ;;  %v1718_v48 = vld [vmem:[#allocation7 + $0x54] ss:$8 sps:$4 sm:$0xff]  }
  0x71   :  { %770 = vmatpush1.bf16.msra.mxu0 %v1583_v29  ;;  %v1642_v29 = vld [vmem:[#allocation5 + $0x274] ss:$8 sps:$4 sm:$0xff]  }
  0x72   :  { %771 = vmatprep.subr.bf16.mxu0 %v1584_v30  ;;  %v1701_v30 = vld [vmem:[#allocation7] ss:$8 sps:$4 sm:$0xff]  }
  0x73   :  { %725 = vmatpush1.bf16.msra.mxu1 %v1661_v51  ;;  %v1716_v51 = vld [vmem:[#allocation7 + $0x50] ss:$8 sps:$4 sm:$0xff]  }
  0x74   :  { %726 = vmatprep.subr.bf16.mxu1 %v1662_v52  ;;  %v1721_v52 = vld [vmem:[#allocation7 + $0x64] ss:$8 sps:$4 sm:$0xff]  }
  0x75   :  { %772 = vmatpush1.bf16.msra.mxu0 %v1586_v33  ;;  %v1640_v33 = vld [vmem:[#allocation5 + $0x270] ss:$8 sps:$4 sm:$0xff]  }
  0x76   :  { %773 = vmatprep.subr.bf16.mxu0 %v1587_v34  ;;  %v1648_v34 = vld [vmem:[#allocation5 + $0x284] ss:$8 sps:$4 sm:$0xff]  }
  0x77   :  { %727 = vmatpush1.bf16.msra.mxu1 %v1667_v57  ;;  %v1676_v57 = vld [vmem:[#allocation5 + $0x2d0] ss:$8 sps:$4 sm:$0xff]  }
  0x78   :  { %728 = vmatprep.subr.bf16.mxu1 %v1668_v60  ;;  %v1727_v60 = vld [vmem:[#allocation7 + $0x84] ss:$8 sps:$4 sm:$0xff]  }
  0x79   :  { %774 = vmatpush1.bf16.msra.mxu0 %v1589_v37  ;;  %v1646_v37 = vld [vmem:[#allocation5 + $0x280] ss:$8 sps:$4 sm:$0xff]  }
  0x7a   :  { %775 = vmatprep.subr.bf16.mxu0 %v1590_v38  ;;  %v1654_v38 = vld [vmem:[#allocation5 + $0x294] ss:$8 sps:$4 sm:$0xff]  }
  0x7b   :  { %729 = vmatpush1.bf16.msra.mxu1 %v1673_v1  ;;  %v1688_v1 = vld [vmem:[#allocation5 + $0x2f0] ss:$8 sps:$4 sm:$0xff]  }
  0x7c   :  { %730 = vmatprep.subr.bf16.mxu1 %v1674_v2  ;;  %v87_v2 = vld [vmem:[#allocation2 + $0x20] sm:$0xff] }
  0x7d   :  { %776 = vmatpush1.bf16.msra.mxu0 %v1592_v41  ;;  %v1652_v41 = vld [vmem:[#allocation5 + $0x290] ss:$8 sps:$4 sm:$0xff]  }
  0x7e   :  { %777 = vmatprep.subr.bf16.mxu0 %v1593_v42  ;;  %v1660_v42 = vld [vmem:[#allocation5 + $0x2a4] ss:$8 sps:$4 sm:$0xff]  }
  0x7f   :  { %731 = vmatpush1.bf16.msra.mxu1 %v1679_v7  ;;  %v1733_v7 = vld [vmem:[#allocation7 + $0xa4] ss:$8 sps:$4 sm:$0xff]  }
  0x80   :  { %732 = vmatprep.subr.bf16.mxu1 %v1680_v9  ;;  %v1731_v9 = vld [vmem:[#allocation7 + $0xa0] ss:$8 sps:$4 sm:$0xff]  }
  0x81   :  { %778 = vmatpush1.bf16.msra.mxu0 %v1595_v45  ;;  %v1658_v45 = vld [vmem:[#allocation5 + $0x2a0] ss:$8 sps:$4 sm:$0xff]  }
  0x82   :  { %779 = vmatprep.subr.bf16.mxu0 %v1596_v46  ;;  %v1666_v46 = vld [vmem:[#allocation5 + $0x2b4] ss:$8 sps:$4 sm:$0xff]  }
  0x83   :  { %733 = vmatpush1.bf16.msra.mxu1 %v1685_v12  ;;  %v1734_v12 = vld [vmem:[#allocation7 + $0xb0] ss:$8 sps:$4 sm:$0xff]  }
  0x84   :  { %734 = vmatprep.subr.bf16.mxu1 %v1686_v13  ;;  %v1739_v13 = vld [vmem:[#allocation7 + $0xc4] ss:$8 sps:$4 sm:$0xff]  }
  0x85   :  { %780 = vmatpush1.bf16.msra.mxu0 %v1598_v49  ;;  %v1664_v49 = vld [vmem:[#allocation5 + $0x2b0] ss:$8 sps:$4 sm:$0xff]  }
  0x86   :  { %781 = vmatprep.subr.bf16.mxu0 %v1599_v50  ;;  %v1672_v50 = vld [vmem:[#allocation5 + $0x2c4] ss:$8 sps:$4 sm:$0xff]  }
  0x87   :  { %735 = vmatpush1.bf16.msra.mxu1 %v1691_v16  ;;  %v1737_v16 = vld [vmem:[#allocation7 + $0xc0] ss:$8 sps:$4 sm:$0xff]  }
  0x88   :  { %736 = vmatprep.subr.bf16.mxu1 %v1692_v17 }
  0x89   :  { %782 = vmatpush1.bf16.msra.mxu0 %v1601_v53  ;;  %v1670_v53 = vld [vmem:[#allocation5 + $0x2c0] ss:$8 sps:$4 sm:$0xff]  }
  0x8a   :  { %794 = vmatprep.subr.bf16.mxu0 %v1604_v56  ;;  %v1724_v56 = vld [vmem:[#allocation7 + $0x74] ss:$8 sps:$4 sm:$0xff]  }
  0x8b   :  { %737 = vmatpush1.bf16.msra.mxu1 %v1697_v20  ;;  %v1745_v20 = vld [vmem:[#allocation7 + $0xe4] ss:$8 sps:$4 sm:$0xff]  }
  0x8c   :  { %784 = vmatmul.mubr.bf16.vlgmr.msra.gmra.mrb[0].mxu0 %v99_v59  ;;  %738 = vmatprep.subr.bf16.mxu1 %v1698_v21  ;;  %v1722_v59 = vld [vmem:[#allocation7 + $0x70] ss:$8 sps:$4 sm:$0xff]   ;;  %v1743_v21 = vld [vmem:[#allocation7 + $0xe0] ss:$8 sps:$4 sm:$0xff]  }
  0x8d   :  { %795 = vmatpush1.bf16.msra.mxu0 %v1602_v58  ;;  %826 = vmatprep.mubr.bf16.mxu0 %v102_v0  ;;  %v1684_v58 = vld [vmem:[#allocation5 + $0x2e4] ss:$8 sps:$4 sm:$0xff]  }
  0x8e   :  { %796 = vmatprep.subr.bf16.mxu0 %v1607_v63  ;;  %v1725_v63 = vld [vmem:[#allocation7 + $0x80] ss:$8 sps:$4 sm:$0xff]   ;;  %v1730_v0 = vld [vmem:[#allocation7 + $0x94] ss:$8 sps:$4 sm:$0xff]  }
  0x8f   :  { %739 = vmatpush1.bf16.msra.mxu1 %v1700_v24  ;;  %v1749_v24 = vld [vmem:[#allocation8 + $0x40] sm:$0xff]  }
  0x90   :  { %1090 = vmatprep.subr.bf16.mxu1 %v1703_v28 }
  0x91   :  { %797 = vmatpush1.bf16.msra.mxu0 %v1605_v3  ;;  %v94_v3 = vld [vmem:[#allocation2 + $0x58] sm:$0xff] }
  0x92   :  { %798 = vmatprep.subr.bf16.mxu0 %v1612_v4  ;;  %741 = vmatmul.mubr.bf16.vlgmr.msra.gmra.mrb[0].mxu1 %v97_v31  ;;  %v1696_v4 = vld [vmem:[#allocation5 + $0x304] ss:$8 sps:$4 sm:$0xff]   ;;  %v101_v6 = vpack.c.bf16 %v94_v3, %v87_v2 }
  0x93   :  { %1091 = vmatpush1.bf16.msra.mxu1 %v1701_v30  ;;  %v1762_v2 = vld [vmem:[#allocation8 + $0x30] sm:$0xff]   ;;  %v1763_v3 = vld [vmem:[#allocation8 + $0x78] sm:$0xff]  }
  0x94   :  { %1092 = vmatprep.subr.bf16.mxu1 %v1706_v32  ;;  %v202_v32 = vld [vmem:[%s2030_s2] sm:$0x3] }
  0x95   :  { %799 = vmatpush1.bf16.msra.mxu0 %v1610_v10  ;;  %v1736_v10 = vld [vmem:[#allocation7 + $0xb4] ss:$8 sps:$4 sm:$0xff]  }
  0x96   :  { %800 = vmatprep.subr.bf16.mxu0 %v1618_v11  ;;  %v1901_v11 = vmov 0  }
  0x97   :  { %1093 = vmatpush1.bf16.msra.mxu1 %v1704_v35 }
  0x98   :  { %1094 = vmatprep.subr.bf16.mxu1 %v1709_v36 }
  0x99   :  { %801 = vmatpush1.bf16.msra.mxu0 %v1616_v14  ;;  %v89_v14 = vld [vmem:[#allocation2 + $0x30] sm:$0xff] }
  0x9a   :  { %802 = vmatprep.subr.bf16.mxu0 %v1624_v15  ;;  %v96_v15 = vld [vmem:[#allocation2 + $0x68] sm:$0xff] }
  0x9b   :  { %1095 = vmatpush1.bf16.msra.mxu1 %v1707_v39  ;;  %v103_v17 = vpack.c.bf16 %v96_v15, %v89_v14 }
  0x9c   :  { %1096 = vmatprep.subr.bf16.mxu1 %v1712_v40 }
  0x9d   :  { %803 = vmatpush1.bf16.msra.mxu0 %v1622_v18  ;;  %v1740_v18 = vld [vmem:[#allocation7 + $0xd0] ss:$8 sps:$4 sm:$0xff]  }
  0x9e   :  { %804 = vmatprep.subr.bf16.mxu0 %v1630_v19  ;;  %v1742_v19 = vld [vmem:[#allocation7 + $0xd4] ss:$8 sps:$4 sm:$0xff]  }
  0x9f   :  { %1097 = vmatpush1.bf16.msra.mxu1 %v1710_v43 }
  0xa0   :  { %1098 = vmatprep.subr.bf16.mxu1 %v1715_v44 }
  0xa1   :  { %805 = vmatpush1.bf16.msra.mxu0 %v1628_v22  ;;  %v1748_v22 = vld [vmem:[#allocation7 + $0xf4] ss:$8 sps:$4 sm:$0xff]  }
  0xa2   :  { %806 = vmatprep.subr.bf16.mxu0 %v1636_v23  ;;  %v1746_v23 = vld [vmem:[#allocation7 + $0xf0] ss:$8 sps:$4 sm:$0xff]  }
  0xa3   :  { %1099 = vmatpush1.bf16.msra.mxu1 %v1713_v47 }
  0xa4   :  { %1100 = vmatprep.subr.bf16.mxu1 %v1718_v48 }
  0xa5   :  { %807 = vmatpush1.bf16.msra.mxu0 %v1634_v25 }
  0xa6   :  { %808 = vmatprep.subr.bf16.mxu0 %v1642_v29  ;;  %v204_v29 = vlaneseq }
  0xa7   :  { %1101 = vmatpush1.bf16.msra.mxu1 %v1716_v51 }
  0xa8   :  { %1102 = vmatprep.subr.bf16.mxu1 %v1721_v52  ;;  %v205_v30 = vshrl.u32 %v204_v29, 7 }
  0xa9   :  { %809 = vmatpush1.bf16.msra.mxu0 %v1640_v33 }
  0xaa   :  { %810 = vmatprep.subr.bf16.mxu0 %v1648_v34  ;;  %v206_v31 = vsub.s32 0, %v205_v30  ;;  %v210_v33 = vsub.s32 1, %v205_v30 }
  0xab   :  { %1103 = vmatpush1.bf16.msra.mxu1 %v1719_v55  ;;  %v1751_v55 = vld [vmem:[#allocation8 + $0x48] sm:$0xff]  }
  0xac   :  { %1104 = vmatprep.subr.bf16.mxu1 %v1724_v56  ;;  %v207_v34 = vrot.slane %v202_v32, %v206_v31  ;;  %v211_v35 = vrot.slane %v202_v32, %v210_v33  ;;  %v1752_v56 = vld [vmem:[#allocation8 + $0x8] sm:$0xff]  }
  0xad   :  { %811 = vmatpush1.bf16.msra.mxu0 %v1646_v37 }
  0xae   :  { %812 = vmatprep.subr.bf16.mxu0 %v1654_v38 }
  0xaf   :  { %1105 = vmatpush1.bf16.msra.mxu1 %v1722_v59  ;;  %v1755_v59 = vld [vmem:[#allocation8 + $0x58] sm:$0xff]  }
  0xb0   :  { %1106 = vmatprep.subr.bf16.mxu1 %v1727_v60  ;;  %v1756_v60 = vld [vmem:[#allocation8 + $0x18] sm:$0xff]  }
  0xb1   :  { %813 = vmatpush1.bf16.msra.mxu0 %v1652_v41 }
  0xb2   :  { %814 = vmatprep.subr.bf16.mxu0 %v1660_v42 }
  0xb3   :  { %1107 = vmatpush1.bf16.msra.mxu1 %v1725_v63  ;;  %v1759_v63 = vld [vmem:[#allocation8 + $0x68] sm:$0xff]  }
  0xb4   :  { %1108 = vmatprep.subr.bf16.mxu1 %v1730_v0  ;;  %v1760_v0 = vld [vmem:[#allocation8 + $0x28] sm:$0xff]  }
  0xb5   :  { %815 = vmatpush1.bf16.msra.mxu0 %v1658_v45 }
  0xb6   :  { %816 = vmatprep.subr.bf16.mxu0 %v1666_v46 }
  0xb7   :  { %1109 = vmatpush1.bf16.msra.mxu1 %v1728_v5  ;;  %v918_v5 = vld [vmem:[%s2032_s4] sm:$0x3] }
  0xb8   :  { %1110 = vmatprep.subr.bf16.mxu1 %v1733_v7  ;;  %v927_v7 = vrot.slane %v918_v5, %v210_v33 }
  0xb9   :  { %817 = vmatpush1.bf16.msra.mxu0 %v1664_v49 }
  0xba   :  { %818 = vmatprep.subr.bf16.mxu0 %v1672_v50 }
  0xbb   :  { %1111 = vmatpush1.bf16.msra.mxu1 %v1731_v9 }
  0xbc   :  { %1112 = vmatprep.subr.bf16.mxu1 %v1736_v10 }
  0xbd   :  { %819 = vmatpush1.bf16.msra.mxu0 %v1670_v53 }
  0xbe   :  { %820 = vmatprep.subr.bf16.mxu0 %v1678_v54  ;;  %v1750_v54 = vld [vmem:[#allocation8] sm:$0xff]  }
  0xbf   :  { %1113 = vmatpush1.bf16.msra.mxu1 %v1734_v12 }
  0xc0   :  { %1114 = vmatprep.subr.bf16.mxu1 %v1739_v13 }
  0xc1   :  { %821 = vmatpush1.bf16.msra.mxu0 %v1676_v57  ;;  %v1753_v57 = vld [vmem:[#allocation8 + $0x50] sm:$0xff]  }
  0xc2   :  { %822 = vmatprep.subr.bf16.mxu0 %v1684_v58  ;;  %v1754_v58 = vld [vmem:[#allocation8 + $0x10] sm:$0xff]  }
  0xc3   :  { %1115 = vmatpush1.bf16.msra.mxu1 %v1737_v16 }
  0xc4   :  { %1116 = vmatprep.subr.bf16.mxu1 %v1742_v19 }
  0xc5   :  { %823 = vmatpush1.bf16.msra.mxu0 %v1682_v61  ;;  %v1757_v61 = vld [vmem:[#allocation8 + $0x60] sm:$0xff]  }
  0xc6   :  { %824 = vmatprep.subr.bf16.mxu0 %v1690_v62  ;;  %v1758_v62 = vld [vmem:[#allocation8 + $0x20] sm:$0xff]  }
  0xc7   :  { %1117 = vmatpush1.bf16.msra.mxu1 %v1740_v18 }
  0xc8   :  { %1118 = vmatprep.subr.bf16.mxu1 %v1745_v20 }
  0xc9   :  { %825 = vmatpush1.bf16.msra.mxu0 %v1688_v1  ;;  %v1761_v1 = vld [vmem:[#allocation8 + $0x70] sm:$0xff]  }
  0xca   :  { %837 = vmatprep.subr.bf16.mxu0 %v1696_v4  ;;  %v1764_v4 = vld [vmem:[#allocation8 + $0x38] sm:$0xff]  }
  0xcb   :  { %1119 = vmatpush1.bf16.msra.mxu1 %v1743_v21 }
  0xcc   :  { %827 = vmatmul.mubr.bf16.vlgmr.msra.gmra.mrb[0].mxu0 %v101_v6  ;;  %1120 = vmatprep.subr.bf16.mxu1 %v1748_v22  ;;  %v923_v6 = vrot.slane %v918_v5, %v206_v31 }
  0xcd   :  { %838 = vmatpush1.bf16.msra.mxu0 %v1694_v8  ;;  %869 = vmatprep.mubr.bf16.mxu0 %v1901_v11 }
  0xcf   :  { %1121 = vmatpush1.bf16.msra.mxu1 %v1746_v23 }
  0xd0   :  { %1504 = vmatprep.subr.bf16.mxu1 %v1749_v24  ;;  %v1487_v24 = vld [vmem:[%s2034_s6] ss:$0 sm:$0xff]  ;;  %s1902_s6 = smov [#allocation10]  }
  0xd1   :  { %s1342_s10 = sshll.u32 %s1902_s6, 4  ;;  %s1343_s10 = int_to_ptr.vmem [resolvable:$true] %s1342_s10 }
  0xd2   :  { %s1861_s13 = scalar_lea.vmem %s1343_s10, 256  ;;  %p1866_p5 = scmp.lt.s32.totalorder %s1343_s10, %s1343_s10 }
  0xd3   :  { %p1862_p4 = scmp.ne.s32.totalorder %s1343_s10, %s1861_s13  ;;  %p1867_p6 = scmp.lt.s32.totalorder %s1861_s13, %s1861_s13 }
  0xd5   :  { %p1868_p7 = por %p1867_p6, %p1866_p5 }
  0xd7   :  { %p1869_p8 = pnand %p1868_p7, %p1862_p4 }
  0xd8   :  { %1454 = vmatmul.mubr.msk.bf16.vlgmr.msra.gmra.mrb[0].mxu0 %vm704_vm0, %v103_v17 }
 0x165   :  { %v742_v25 = vpop.f32.mrb[0].mxu1 }
 0x166   :  { %v744_v26 = vpop.f32.mrb[1].mxu1  ;;  %v743_v36 = vadd.f32 %v742_v25, %v207_v34 }
 0x167   :  { %v746_v27 = vpop.f32.mrb[2].mxu1  ;;  %v745_v37 = vadd.f32 %v744_v26, %v211_v35 }
 0x168   :  { %v748_v28 = vpop.f32.mrb[3].mxu1  ;;  %v747_v39 = vadd.f32 %v746_v27, %v207_v34 }
 0x169   :  { %v749_v42 = vadd.f32 %v748_v28, %v211_v35 }
 0x1ab   :  { %v871_v38 = vpop.f32.mrb[0].mxu0 }
 0x1ac   :  { %v1527_v40 = vadd.f32 %v871_v38, %v743_v36  ;;  %v873_v41 = vpop.f32.mrb[1].mxu0 }
 0x1ad   :  { %v1529_v43 = vadd.f32 %v873_v41, %v745_v37  ;;  %v875_v44 = vpop.f32.mrb[2].mxu0 }
 0x1ae   :  { %v1531_v45 = vadd.f32 %v875_v44, %v747_v39  ;;  %v877_v46 = vpop.f32.mrb[3].mxu0  ;;  %v880_v48 = vmax.f32 %v1527_v40, 0.0 }
 0x1af   :  { %v1533_v47 = vadd.f32 %v877_v46, %v749_v42  ;;  %v881_v50 = vmax.f32 %v1529_v43, 0.0 }
 0x1b0   :  { %v882_v49 = vmax.f32 %v1531_v45, 0.0 }
 0x1b1   :  { %v883_v51 = vmax.f32 %v1533_v47, 0.0 }
 0x1b2   :  { %v884_v52 = vpack.c.bf16 %v882_v49, %v880_v48 }
 0x1b3   :  { %v885_v53 = vpack.c.bf16 %v883_v51, %v881_v50 }
 0x1b5   :  { %1122 = vmatprep.mubr.bf16.mxu1 %v885_v53 }
 0x1b6   :  { %1123 = vmatmul.mubr.bf16.vlgmr.msra.gmra.mrb[4].mxu1 %v884_v52 }
 0x1b7   :  { %1505 = vmatpush3.bf16.msra.mxu1 %v1750_v54 }
 0x1b8   :  { %1506 = vmatprep.subr.bf16.mxu1 %v1751_v55 }
 0x1bb   :  { %1507 = vmatpush3.bf16.msra.mxu1 %v1752_v56 }
 0x1bc   :  { %1508 = vmatprep.subr.bf16.mxu1 %v1753_v57 }
 0x1bf   :  { %1509 = vmatpush3.bf16.msra.mxu1 %v1754_v58 }
 0x1c0   :  { %1510 = vmatprep.subr.bf16.mxu1 %v1755_v59 }
 0x1c3   :  { %1511 = vmatpush3.bf16.msra.mxu1 %v1756_v60 }
 0x1c4   :  { %1512 = vmatprep.subr.bf16.mxu1 %v1757_v61 }
 0x1c7   :  { %1513 = vmatpush3.bf16.msra.mxu1 %v1758_v62 }
 0x1c8   :  { %1514 = vmatprep.subr.bf16.mxu1 %v1759_v63 }
 0x1cb   :  { %1515 = vmatpush3.bf16.msra.mxu1 %v1760_v0 }
 0x1cc   :  { %1516 = vmatprep.subr.bf16.mxu1 %v1761_v1 }
 0x1cf   :  { %1517 = vmatpush3.bf16.msra.mxu1 %v1762_v2 }
 0x1d0   :  { %1518 = vmatprep.subr.bf16.mxu1 %v1763_v3 }
 0x1d3   :  { %1519 = vmatpush3.bf16.msra.mxu1 %v1764_v4 }
 0x289   :  { %v1124_v8 = vpop.f32.mrb[4].mxu1 }
 0x28a   :  { %v1125_v9 = vadd.f32 %v1124_v8, %v923_v6  ;;  %v1126_v10 = vpop.f32.mrb[5].mxu1 }
 0x28b   :  { %v1127_v11 = vadd.f32 %v1126_v10, %v927_v7  ;;  %v1128_v12 = vpop.f32.mrb[6].mxu1 }
 0x28c   :  { %v1129_v13 = vadd.f32 %v1128_v12, %v923_v6  ;;  %v1130_v14 = vpop.f32.mrb[7].mxu1  ;;  %v1133_v16 = vmax.f32 %v1125_v9, 0.0 }
 0x28d   :  { %v1131_v15 = vadd.f32 %v1130_v14, %v927_v7  ;;  %v1134_v18 = vmax.f32 %v1127_v11, 0.0 }
 0x28e   :  { %v1135_v17 = vmax.f32 %v1129_v13, 0.0 }
 0x28f   :  { %v1136_v19 = vmax.f32 %v1131_v15, 0.0 }
 0x290   :  { %v1137_v20 = vpack.c.bf16 %v1135_v17, %v1133_v16 }
 0x291   :  { %v1138_v21 = vpack.c.bf16 %v1136_v19, %v1134_v18 }
 0x293   :  { %1306 = vmatprep.mubr.bf16.mxu1 %v1138_v21 }
 0x294   :  { %1307 = vmatmul.mubr.bf16.vlgmr.msra.gmra.mrb[8].mxu1 %v1137_v20 }
 0x367   :  { %v1520_v22 = vpop.f32.mrb[8].mxu1 }
 0x368   :  { %v1521_v23 = vpop.f32.mrb[9].mxu1 }
 0x369   :  { %v1522_v25 = vadd.f32 %v1521_v23, %v1520_v22  ;;  %v1523_v26 = vpop.f32.mrb[10].mxu1 }
 0x36a   :  { %v1524_v27 = vpop.f32.mrb[11].mxu1 }
 0x36b   :  { %v1525_v28 = vadd.f32 %v1524_v27, %v1523_v26  ;;  %v1309_v29 = vadd.f32 %v1522_v25, %v1487_v24 }
 0x36d   :  { %1315 = vmax.xlane.f32.xlu0 %v1309_v29  ;;  %v1312_v30 = vadd.f32 %v1525_v28, %v1487_v24 }
 0x371   :  { %1317 = vmax.xlane.f32.xlu0 %v1312_v30 }
 0x3fa   :  { %v1316_v31 = vpop.xlane.xlu0 %1315 }
 0x3fb   :  { %v1319_v32 = vsub.f32 %v1309_v29, %v1316_v31 }
 0x3fd   :  { %v1321_v33 = vmul.f32 1.442695, %v1319_v32 }
 0x3fe   :  { %v1318_v34 = vpop.xlane.xlu0 %1317 }
 0x3ff   :  { %v1320_v35 = vsub.f32 %v1312_v30, %v1318_v34  ;;  %1765 = vpow2.f32 %v1321_v33 }
 0x401   :  { %v1323_v36 = vmul.f32 1.442695, %v1320_v35 }
 0x403   :  { %1767 = vpow2.f32 %v1323_v36 }
 0x409   :  { %v1766_v37 = vpop.eup %1765 }
 0x40a   :  { %1325 = vadd.xlane.f32.xlu1 %v1766_v37 }
 0x40d   :  { %v1768_v38 = vpop.eup %1767 }
 0x40e   :  { %1327 = vadd.xlane.f32.xlu1 %v1768_v38 }
 0x497   :  { %v1326_v39 = vpop.xlane.xlu1 %1325 }
 0x498   :  { %1769 = vlog2.f32 %v1326_v39 }
 0x49b   :  { %v1328_v40 = vpop.xlane.xlu1 %1327 }
 0x49c   :  { %1771 = vlog2.f32 %v1328_v40 }
 0x4a2   :  { %v1770_v41 = vpop.eup %1769 }
 0x4a3   :  { %v1330_v42 = vmul.f32 0.6931472, %v1770_v41 }
 0x4a5   :  { %v1333_v43 = vsub.f32 %v1319_v32, %v1330_v42 }
 0x4a6   :  { %v1772_v44 = vpop.eup %1771 }
 0x4a7   :  { %1335 = vst [vmem:[#allocation10] sm:$0xff] %v1333_v43  ;;  %v1332_v45 = vmul.f32 0.6931472, %v1772_v44 }
 0x4a9   :  { %v1334_v46 = vsub.f32 %v1320_v35, %v1332_v45 }
 0x4ab   :  { %1336 = vst [vmem:[#allocation10 + $0x8] sm:$0xff] %v1334_v46 }
 0x4ac   :  { %1872 = shalt.err (!%p1869_p8)
}
 0x4ad   :  { %s1873_s17 = scalar_lea.hbm %s2035_s7, 256 }
 0x4ae   :  { %p1874_p9 = scmp.ne.s32.totalorder %s2035_s7, %s1873_s17  ;;  %p1877_p10 = scmp.lt.u32.totalorder %s1873_s17, %s2035_s7 }
 0x4b0   :  { %p1879_p11 = pnand %p1877_p10, %p1874_p9 }
 0x4b2   :  { %1882 = shalt.err (!%p1879_p11)
}
 0x4b3   :  { %1348 = dma.vmem_to_hbm [thread:$0]  %s1343_s10, 256, %s2035_s7, [#allocation4], %s1892_s11, %s1892_s11, %s1893_s12  }
 0x4b4   :  { %1889 = dma.done.wait [#allocation4], 256  }
 0x4b5   :  { %1890 = vsyncadd [#allocation4], 4294967040 }
 0x4b6   :  { %1352 = vsyncpa [#allocation3], 1 }
 0x4b7   :  { %1353 = vsyncpa [#allocation6], 1 }
 0x4b8   :  { %1354 = vsyncpa [#allocation9], 1 }
 0x4b9   :  { %1355 = vsyncpa [#allocation4], 1 }

</bundles_post_ra>
